<compile_context>
chip_gen: v6e
topology: v6e:2x2x1
jax: 0.10.0
libtpu: 0.0.40
codegen_flags: <defaults>
</compile_context>

<pallas_src>
import jax
import jax.numpy as jnp
from jax import lax
from jax.experimental import pallas as pl
from jax.experimental.pallas import tpu as pltpu

NUM_FEATS = 3          # the module always builds 3 embedding tables
VOCAB = 20             # nn.Embedding(20, emb_dim)
PADDED_VOCAB = 64      # 3*20 = 60 rows, zero-padded to 64 for the fused matmul


def _round_up(x, m):
    return -(-x // m) * m


def _vmem_capacity_bytes():
    try:
        return int(pltpu.get_tpu_info().vmem_capacity_bytes)
    except Exception:
        return 64 * 1024 * 1024        # conservative fallback (v7x per-TC VMEM)


def pack_edge_tables(tables, dtype=jnp.float32):
    """(3, 20, D) embedding tables -> fused (64, D) slab.

    Build this ONCE per weight update (not per forward call): rows [20i, 20i+20)
    hold table i, rows 60..63 are zero.  Pass dtype=jnp.bfloat16 for the
    halved-write-traffic variant (rounds the stored embeddings).
    """
    F, V, D = tables.shape
    assert F == NUM_FEATS and V == VOCAB
    fused = jnp.zeros((PADDED_VOCAB, D), dtype)
    return fused.at[:F * V].set(tables.reshape(F * V, D).astype(dtype))


def edge_encoder_kernel(attr_ref, table_ref, out_ref):
    # attr_ref  : (tng, g*3) int32   -- g edge rows packed per sublane row
    # table_ref : (64, D)            -- fused embedding tables (VMEM resident)
    # out_ref   : (tng, g*D)         -- lane-dense packed output
    tng, gf = attr_ref.shape
    g = gf // NUM_FEATS
    D = table_ref.shape[1]

    attr = attr_ref[...]
    table = table_ref[...]
    # Tile-invariant iota over the fused 64-row vocabulary (hoisted out of
    # the unrolled loops below).
    col = lax.broadcasted_iota(jnp.int32, (tng, PADDED_VOCAB), 1)

    for j in range(g):                              # static unroll (packed rows)
        hot = None
        for i in range(NUM_FEATS):                  # static unroll (3 features)
            k = j * NUM_FEATS + i
            tgt = attr[:, k:k + 1] + i * VOCAB      # (tng, 1)
            m = col == tgt                          # (tng, 64) bool
            hot = m if hot is None else (hot | m)   # int compares + OR, 1 cast
        onehot = hot.astype(table.dtype)            # 3 ones per row (multi-hot)
        # (tng, 64) x (64, D) on the MXU; HIGHEST keeps the exact f32 gather
        # numerics (one-hot values are exact, table recovered to f32).
        res = jnp.dot(onehot, table,
                      preferred_element_type=jnp.float32,
                      precision=lax.Precision.HIGHEST)
        out_ref[:, j * D:(j + 1) * D] = res.astype(out_ref.dtype)


def edge_encoder(edge_attr, tables, *, out_dtype=None,
                 target_out_block_bytes=2 * 1024 * 1024):
    """edge_attr: (N, 3) int -> (N, D).

    `tables` is preferably the pre-fused (64, D) slab from pack_edge_tables()
    (hoists the packing out of the per-call path); a raw (3, 20, D) stack is
    also accepted and fused on the fly.
    """
    if tables.ndim == 3:
        tables = pack_edge_tables(tables)      # slow path; prefer pre-packing
    PV, D = tables.shape
    assert PV == PADDED_VOCAB
    N, F = edge_attr.shape
    assert F == NUM_FEATS

    out_dtype = tables.dtype if out_dtype is None else jnp.dtype(out_dtype)
    osz = jnp.dtype(out_dtype).itemsize
    tsz = jnp.dtype(tables.dtype).itemsize

    # PyTorch typically supplies int64 indices; compare in int32 in the kernel.
    edge_attr = edge_attr.astype(jnp.int32)

    # Lane-packing factor: for small D pack g rows per output row so the output
    # block has lane width g*D == 128 -> unmasked, lane-dense HBM stores.
    g = 128 // D if (D < 128 and 128 % D == 0) else 1
    row_unit = 8 * g

    # Row tile from the target output-block size (~2 MiB), clamped to padded N.
    tn = max(row_unit,
             (target_out_block_bytes // (D * osz)) // row_unit * row_unit)
    tn = min(tn, _round_up(N, row_unit))

    # Per-generation VMEM budget (3/4 of capacity: ~48 MiB v7x, ~96 MiB v5e/v6e).
    budget = (_vmem_capacity_bytes() * 3) // 4

    def vmem_need(rows):
        tng_ = rows // g
        attr_blk = tng_ * 128 * 4                            # int32, lane-padded
        out_blk = tng_ * _round_up(g * D, 128) * osz
        tab_blk = PADDED_VOCAB * _round_up(D, 128) * tsz     # resident table
        tmp = rows * PADDED_VOCAB * 4 * 2 + rows * D * 4     # one-hot + dot temps
        # attr/out double-buffered by the pipeline; table double-buffered too
        # (default) -> counted at 2x.
        return 2 * attr_blk + 2 * out_blk + 2 * tab_blk + tmp + (2 << 20)

    while tn > row_unit and vmem_need(tn) > budget:
        tn = max(row_unit, (tn // 2) // row_unit * row_unit)

    # Pad rows to a tile multiple (padded rows read index 0, sliced off below).
    n_pad = _round_up(N, tn)
    attr_p = edge_attr if n_pad == N else jnp.pad(edge_attr,
                                                  ((0, n_pad - N), (0, 0)))
    attr_p = attr_p.reshape(n_pad // g, g * F)
    tng = tn // g

    out = pl.pallas_call(
        edge_encoder_kernel,
        out_shape=jax.ShapeDtypeStruct((n_pad // g, g * D), out_dtype),
        grid_spec=pltpu.PrefetchScalarGridSpec(
            num_scalar_prefetch=0,
            grid=(n_pad // tn,),
            in_specs=[
                pl.BlockSpec((tng, g * F), lambda i: (i, 0)),
                # Fused table: constant index map -> fetched once, VMEM resident.
                # TODO(synk): pipeline_mode=pl.Buffered(1) would drop its second
                # buffer on v7x; kept default buffering for lowering safety and
                # accounted for 2x in the VMEM budget above instead.
                pl.BlockSpec((PADDED_VOCAB, D), lambda i: (0, 0)),
            ],
            out_specs=pl.BlockSpec((tng, g * D), lambda i: (i, 0)),
        ),
        compiler_params=pltpu.CompilerParams(
            # "parallel" lets large-N grids shard across both TensorCores on
            # v7x (no-op on v5e/v6e, which have a single TC).
            dimension_semantics=("parallel",),
            vmem_limit_bytes=int(budget),
        ),
        cost_estimate=pl.CostEstimate(
            flops=2 * n_pad * PADDED_VOCAB * D,
            transcendentals=0,
            bytes_accessed=(n_pad * F * 4            # edge_attr read
                            + n_pad * D * osz        # output write
                            + PADDED_VOCAB * D * tsz),
        ),
    )(attr_p, tables)

    out = out.reshape(n_pad, D)
    return out[:N] if n_pad != N else out


if __name__ == "__main__":
    key = jax.random.PRNGKey(0)

    def reference(tables, edge_attr):
        ref = jnp.zeros((edge_attr.shape[0], tables.shape[-1]), jnp.float32)
        for i in range(NUM_FEATS):
            ref = ref + jnp.take(tables[i], edge_attr[:, i], axis=0)
        return ref

    # Case 1 exercises the lane-dense packed path (D=32 -> g=4) and row padding;
    # case 2 exercises the unpacked path (D=128 -> g=1).
    for emb_dim, n_edges in [(32, 19), (128, 50)]:
        k_tab, k_attr, key = jax.random.split(key, 3)
        tables = jax.random.normal(k_tab, (NUM_FEATS, VOCAB, emb_dim),
                                   dtype=jnp.float32)
        edge_attr = jax.random.randint(k_attr, (n_edges, NUM_FEATS), 0, VOCAB,
                                       dtype=jnp.int32)

        fused = pack_edge_tables(tables)     # hoisted: once per weight update
        out = jax.block_until_ready(edge_encoder(edge_attr, fused))

        ref = reference(tables, edge_attr)
        assert out.shape == (n_edges, emb_dim)
        assert jnp.allclose(out, ref, atol=1e-5, rtol=1e-5), (emb_dim, n_edges)

    print("KERNEL_OK")
</pallas_src>

<mosaic_0001>
module attributes {stable_mosaic.version = 11 : i64} {
  func.func @edge_encoder_kernel(%arg0: i32, %arg1: memref<8x12xi32, #tpu.memory_space<vmem>>, %arg2: memref<64x32xf32, #tpu.memory_space<vmem>>, %arg3: memref<8x128xf32, #tpu.memory_space<vmem>>) attributes {dimension_semantics = [#tpu.dimension_semantics<parallel>], iteration_bounds = array<i64: 1>, scalar_prefetch = 0 : i64, scratch_operands = 0 : i64, tpu.core_type = #tpu.core_type<tc>, window_params = [{transform_indices = @transform_0, window_bounds = array<i64: 8, 12>}, {pipeline_mode = #tpu.pipeline_mode<synchronous>, transform_indices = @transform_1, window_bounds = array<i64: 64, 32>}, {transform_indices = @transform_2, window_bounds = array<i64: 8, 128>}]} {
    %c0 = arith.constant 0 : index
    %c0_0 = arith.constant 0 : index
    %0 = vector.load %arg1[%c0, %c0_0] : memref<8x12xi32, #tpu.memory_space<vmem>>, vector<8x12xi32>
    %c0_1 = arith.constant 0 : index
    %c0_2 = arith.constant 0 : index
    %1 = vector.load %arg2[%c0_1, %c0_2] : memref<64x32xf32, #tpu.memory_space<vmem>>, vector<64x32xf32>
    %2 = tpu.iota {dimensions = array<i32: 1>} : vector<8x64xi32>
    %3 = vector.extract_strided_slice %0 {offsets = [0, 0], sizes = [8, 1], strides = [1, 1]} : vector<8x12xi32> to vector<8x1xi32>
    %c0_i32 = arith.constant 0 : i32
    %4 = vector.broadcast %c0_i32 : i32 to vector<8x1xi32>
    %5 = arith.addi %3, %4 : vector<8x1xi32>
    %6 = vector.broadcast %5 : vector<8x1xi32> to vector<8x64xi32>
    %7 = arith.cmpi eq, %2, %6 : vector<8x64xi32>
    %8 = vector.extract_strided_slice %0 {offsets = [0, 1], sizes = [8, 1], strides = [1, 1]} : vector<8x12xi32> to vector<8x1xi32>
    %c20_i32 = arith.constant 20 : i32
    %9 = vector.broadcast %c20_i32 : i32 to vector<8x1xi32>
    %10 = arith.addi %8, %9 : vector<8x1xi32>
    %11 = vector.broadcast %10 : vector<8x1xi32> to vector<8x64xi32>
    %12 = arith.cmpi eq, %2, %11 : vector<8x64xi32>
    %13 = arith.ori %7, %12 : vector<8x64xi1>
    %14 = vector.extract_strided_slice %0 {offsets = [0, 2], sizes = [8, 1], strides = [1, 1]} : vector<8x12xi32> to vector<8x1xi32>
    %c40_i32 = arith.constant 40 : i32
    %15 = vector.broadcast %c40_i32 : i32 to vector<8x1xi32>
    %16 = arith.addi %14, %15 : vector<8x1xi32>
    %17 = vector.broadcast %16 : vector<8x1xi32> to vector<8x64xi32>
    %18 = arith.cmpi eq, %2, %17 : vector<8x64xi32>
    %19 = arith.ori %13, %18 : vector<8x64xi1>
    %20 = arith.extui %19 : vector<8x64xi1> to vector<8x64xi32>
    %21 = arith.sitofp %20 : vector<8x64xi32> to vector<8x64xf32>
    %cst = arith.constant dense<0.000000e+00> : vector<8x32xf32>
    %22 = tpu.matmul %21, %1, %cst {dimension_numbers = #tpu.dot_dimension_numbers<[1], [0], [0], [1], [0, 0, 1, 1], [], []>, precision = #tpu.contract_precision<fp32>} : vector<8x64xf32>, vector<64x32xf32>, vector<8x32xf32> -> vector<8x32xf32>
    %c0_3 = arith.constant 0 : index
    %c0_4 = arith.constant 0 : index
    %23 = vector.load %arg3[%c0_3, %c0_4] : memref<8x128xf32, #tpu.memory_space<vmem>>, vector<8x32xf32>
    tpu.vector_store %arg3[%c0_3, %c0_4], %22 {strides = array<i32>} : memref<8x128xf32, #tpu.memory_space<vmem>>, vector<8x32xf32>,
    %24 = vector.extract_strided_slice %0 {offsets = [0, 3], sizes = [8, 1], strides = [1, 1]} : vector<8x12xi32> to vector<8x1xi32>
    %c0_i32_5 = arith.constant 0 : i32
    %25 = vector.broadcast %c0_i32_5 : i32 to vector<8x1xi32>
    %26 = arith.addi %24, %25 : vector<8x1xi32>
    %27 = vector.broadcast %26 : vector<8x1xi32> to vector<8x64xi32>
    %28 = arith.cmpi eq, %2, %27 : vector<8x64xi32>
    %29 = vector.extract_strided_slice %0 {offsets = [0, 4], sizes = [8, 1], strides = [1, 1]} : vector<8x12xi32> to vector<8x1xi32>
    %c20_i32_6 = arith.constant 20 : i32
    %30 = vector.broadcast %c20_i32_6 : i32 to vector<8x1xi32>
    %31 = arith.addi %29, %30 : vector<8x1xi32>
    %32 = vector.broadcast %31 : vector<8x1xi32> to vector<8x64xi32>
    %33 = arith.cmpi eq, %2, %32 : vector<8x64xi32>
    %34 = arith.ori %28, %33 : vector<8x64xi1>
    %35 = vector.extract_strided_slice %0 {offsets = [0, 5], sizes = [8, 1], strides = [1, 1]} : vector<8x12xi32> to vector<8x1xi32>
    %c40_i32_7 = arith.constant 40 : i32
    %36 = vector.broadcast %c40_i32_7 : i32 to vector<8x1xi32>
    %37 = arith.addi %35, %36 : vector<8x1xi32>
    %38 = vector.broadcast %37 : vector<8x1xi32> to vector<8x64xi32>
    %39 = arith.cmpi eq, %2, %38 : vector<8x64xi32>
    %40 = arith.ori %34, %39 : vector<8x64xi1>
    %41 = arith.extui %40 : vector<8x64xi1> to vector<8x64xi32>
    %42 = arith.sitofp %41 : vector<8x64xi32> to vector<8x64xf32>
    %cst_8 = arith.constant dense<0.000000e+00> : vector<8x32xf32>
    %43 = tpu.matmul %42, %1, %cst_8 {dimension_numbers = #tpu.dot_dimension_numbers<[1], [0], [0], [1], [0, 0, 1, 1], [], []>, precision = #tpu.contract_precision<fp32>} : vector<8x64xf32>, vector<64x32xf32>, vector<8x32xf32> -> vector<8x32xf32>
    %c0_9 = arith.constant 0 : index
    %c32 = arith.constant 32 : index
    %44 = vector.load %arg3[%c0_9, %c32] : memref<8x128xf32, #tpu.memory_space<vmem>>, vector<8x32xf32>
    tpu.vector_store %arg3[%c0_9, %c32], %43 {strides = array<i32>} : memref<8x128xf32, #tpu.memory_space<vmem>>, vector<8x32xf32>,
    %45 = vector.extract_strided_slice %0 {offsets = [0, 6], sizes = [8, 1], strides = [1, 1]} : vector<8x12xi32> to vector<8x1xi32>
    %c0_i32_10 = arith.constant 0 : i32
    %46 = vector.broadcast %c0_i32_10 : i32 to vector<8x1xi32>
    %47 = arith.addi %45, %46 : vector<8x1xi32>
    %48 = vector.broadcast %47 : vector<8x1xi32> to vector<8x64xi32>
    %49 = arith.cmpi eq, %2, %48 : vector<8x64xi32>
    %50 = vector.extract_strided_slice %0 {offsets = [0, 7], sizes = [8, 1], strides = [1, 1]} : vector<8x12xi32> to vector<8x1xi32>
    %c20_i32_11 = arith.constant 20 : i32
    %51 = vector.broadcast %c20_i32_11 : i32 to vector<8x1xi32>
    %52 = arith.addi %50, %51 : vector<8x1xi32>
    %53 = vector.broadcast %52 : vector<8x1xi32> to vector<8x64xi32>
    %54 = arith.cmpi eq, %2, %53 : vector<8x64xi32>
    %55 = arith.ori %49, %54 : vector<8x64xi1>
    %56 = vector.extract_strided_slice %0 {offsets = [0, 8], sizes = [8, 1], strides = [1, 1]} : vector<8x12xi32> to vector<8x1xi32>
    %c40_i32_12 = arith.constant 40 : i32
    %57 = vector.broadcast %c40_i32_12 : i32 to vector<8x1xi32>
    %58 = arith.addi %56, %57 : vector<8x1xi32>
    %59 = vector.broadcast %58 : vector<8x1xi32> to vector<8x64xi32>
    %60 = arith.cmpi eq, %2, %59 : vector<8x64xi32>
    %61 = arith.ori %55, %60 : vector<8x64xi1>
    %62 = arith.extui %61 : vector<8x64xi1> to vector<8x64xi32>
    %63 = arith.sitofp %62 : vector<8x64xi32> to vector<8x64xf32>
    %cst_13 = arith.constant dense<0.000000e+00> : vector<8x32xf32>
    %64 = tpu.matmul %63, %1, %cst_13 {dimension_numbers = #tpu.dot_dimension_numbers<[1], [0], [0], [1], [0, 0, 1, 1], [], []>, precision = #tpu.contract_precision<fp32>} : vector<8x64xf32>, vector<64x32xf32>, vector<8x32xf32> -> vector<8x32xf32>
    %c0_14 = arith.constant 0 : index
    %c64 = arith.constant 64 : index
    %65 = vector.load %arg3[%c0_14, %c64] : memref<8x128xf32, #tpu.memory_space<vmem>>, vector<8x32xf32>
    tpu.vector_store %arg3[%c0_14, %c64], %64 {strides = array<i32>} : memref<8x128xf32, #tpu.memory_space<vmem>>, vector<8x32xf32>,
    %66 = vector.extract_strided_slice %0 {offsets = [0, 9], sizes = [8, 1], strides = [1, 1]} : vector<8x12xi32> to vector<8x1xi32>
    %c0_i32_15 = arith.constant 0 : i32
    %67 = vector.broadcast %c0_i32_15 : i32 to vector<8x1xi32>
    %68 = arith.addi %66, %67 : vector<8x1xi32>
    %69 = vector.broadcast %68 : vector<8x1xi32> to vector<8x64xi32>
    %70 = arith.cmpi eq, %2, %69 : vector<8x64xi32>
    %71 = vector.extract_strided_slice %0 {offsets = [0, 10], sizes = [8, 1], strides = [1, 1]} : vector<8x12xi32> to vector<8x1xi32>
    %c20_i32_16 = arith.constant 20 : i32
    %72 = vector.broadcast %c20_i32_16 : i32 to vector<8x1xi32>
    %73 = arith.addi %71, %72 : vector<8x1xi32>
    %74 = vector.broadcast %73 : vector<8x1xi32> to vector<8x64xi32>
    %75 = arith.cmpi eq, %2, %74 : vector<8x64xi32>
    %76 = arith.ori %70, %75 : vector<8x64xi1>
    %77 = vector.extract_strided_slice %0 {offsets = [0, 11], sizes = [8, 1], strides = [1, 1]} : vector<8x12xi32> to vector<8x1xi32>
    %c40_i32_17 = arith.constant 40 : i32
    %78 = vector.broadcast %c40_i32_17 : i32 to vector<8x1xi32>
    %79 = arith.addi %77, %78 : vector<8x1xi32>
    %80 = vector.broadcast %79 : vector<8x1xi32> to vector<8x64xi32>
    %81 = arith.cmpi eq, %2, %80 : vector<8x64xi32>
    %82 = arith.ori %76, %81 : vector<8x64xi1>
    %83 = arith.extui %82 : vector<8x64xi1> to vector<8x64xi32>
    %84 = arith.sitofp %83 : vector<8x64xi32> to vector<8x64xf32>
    %cst_18 = arith.constant dense<0.000000e+00> : vector<8x32xf32>
    %85 = tpu.matmul %84, %1, %cst_18 {dimension_numbers = #tpu.dot_dimension_numbers<[1], [0], [0], [1], [0, 0, 1, 1], [], []>, precision = #tpu.contract_precision<fp32>} : vector<8x64xf32>, vector<64x32xf32>, vector<8x32xf32> -> vector<8x32xf32>
    %c0_19 = arith.constant 0 : index
    %c96 = arith.constant 96 : index
    %86 = vector.load %arg3[%c0_19, %c96] : memref<8x128xf32, #tpu.memory_space<vmem>>, vector<8x32xf32>
    tpu.vector_store %arg3[%c0_19, %c96], %85 {strides = array<i32>} : memref<8x128xf32, #tpu.memory_space<vmem>>, vector<8x32xf32>,
    return
  }
  func.func @transform_0(%arg0: i32) -> (i32, i32) {
    %c0_i32 = arith.constant 0 : i32
    %c0_i32_0 = arith.constant 0 : i32
    return %arg0, %c0_i32 : i32, i32
  }
  func.func @transform_1(%arg0: i32) -> (i32, i32) {
    %c0_i32 = arith.constant 0 : i32
    %c0_i32_0 = arith.constant 0 : i32
    %c0_i32_1 = arith.constant 0 : i32
    return %c0_i32, %c0_i32_0 : i32, i32
  }
  func.func @transform_2(%arg0: i32) -> (i32, i32) {
    %c0_i32 = arith.constant 0 : i32
    %c0_i32_0 = arith.constant 0 : i32
    return %arg0, %c0_i32 : i32, i32
  }
}

</mosaic_0001>

<bundles_post_ra>
// kernel: tpu_custom_call.1
= control target key start
LH: loop header
LB: loop body
LE: loop exit
PB: predicated region body
PF: predicated region fallthrough
CT: control target
= control target key end

     0   :  { %v3024_v2 = vmov 0   ;;  %v3025_v3 = vmov 2   ;;  %v3026_v10 = vmov 0.0   ;;  %s3708_s0 = inlined_call_operand.vmem [shape: s32[8,12], index: 0, kind: input, shape index: {}]   ;;  %s3709_s1 = inlined_call_operand.vmem [shape: f32[64,32], index: 1, kind: input, shape index: {}]   ;;  %s3710_s2 = inlined_call_operand.hbm [shape: f32[8,128], index: 2, kind: output, shape index: {}]  }
   0x1   :  { %v3060_v0 = vld [vmem:[%s3708_s0] sm:$0xff]  ;;  %v20_v1 = vld [vmem:[%s3709_s1 + $0x38] sm:$0xff]  ;;  %2990 = vset.pattern.permute.xlu0 %v3024_v2  ;;  %2992 = vset.pattern.permute.xlu1 %v3025_v3  ;;  %v19_v5 = vld [vmem:[%s3709_s1 + $0x30] sm:$0xff] }
   0x2   :  { %v3066_v4 = vadd.s32 40, %v3060_v0  ;;  %v18_v6 = vld [vmem:[%s3709_s1 + $0x28] sm:$0xff]  ;;  %24 = vperm.xlu0 %2990, %v3060_v0   ;;  %v3076_v7 = vadd.s32 20, %v3060_v0  ;;  %v17_v8 = vld [vmem:[%s3709_s1 + $0x20] sm:$0xff]  ;;  %v16_v9 = vld [vmem:[%s3709_s1 + $0x18] sm:$0xff]  ;;  %2535 = vmatprep.subr.mxu1 %v3026_v10  ;;  %v3086_v11 = vand.u32 4294901760, %v20_v1 }
   0x3   :  { %v3088_v12 = vand.u32 4294901760, %v19_v5  ;;  %v3090_v13 = vand.u32 4294901760, %v18_v6  ;;  %v3092_v14 = vand.u32 4294901760, %v17_v8  ;;  %v15_v15 = vld [vmem:[%s3709_s1 + $0x10] sm:$0xff]  ;;  %v14_v16 = vld [vmem:[%s3709_s1 + $0x8] sm:$0xff]  ;;  %2516 = vmatprep.subr.mxu0 %v3026_v10  ;;  %v3101_v17 = vand.u32 4294901760, %v16_v9 }
   0x4   :  { %35 = vperm.xlu1 %2992, %v3066_v4   ;;  %v3103_v18 = vand.u32 4294901760, %v15_v15 }
   0x5   :  { %7 = vsyncpa [#allocation3], 0  ;;  %v3106_v19 = vsub.f32 %v20_v1, %v3086_v11  ;;  %v3109_v20 = vsub.f32 %v19_v5, %v3088_v12  ;;  %v3112_v21 = vsub.f32 %v18_v6, %v3090_v13  ;;  %v3115_v22 = vsub.f32 %v17_v8, %v3092_v14  ;;  %2517 = vmatpush3.msra.mxu0 %v3086_v11  ;;  %v13_v30 = vld [vmem:[%s3709_s1] sm:$0xff]  ;;  %s3038_s1 = smov 32   ;;  %s3039_s26 = smov 64  }
   0x6   :  { %v3027_v23 = vmov 1   ;;  %v3119_v24 = vsub.f32 %v16_v9, %v3101_v17  ;;  %2518 = vmatprep.subr.mxu0 %v3026_v10  ;;  %v3122_v25 = vand.u32 4294901760, %v14_v16  ;;  %v3028_v26 = vmov 3   ;;  %s3040_s27 = smov 96   ;;  %s3041_s28 = smov [#allocation2]  }
   0x7   :  { %2991 = vset.pattern.permute.xlu0 %v3027_v23  ;;  %v3126_v27 = vand.u32 4294901760, %v3106_v19  ;;  %v3129_v28 = vand.u32 4294901760, %v3109_v20  ;;  %v3132_v29 = vand.u32 4294901760, %v3112_v21  ;;  %v3139_v31 = vand.u32 4294901760, %v3115_v22  ;;  %2519 = vmatpush3.msra.mxu0 %v3088_v12  ;;  %s2276_s29 = sshll.u32 %s3041_s28, 4  ;;  %s2277_s29 = int_to_ptr.vmem [resolvable:$true] %s2276_s29 }
   0x8   :  { %29 = vperm.xlu0 %2991, %v3076_v7   ;;  %2993 = vset.pattern.permute.xlu1 %v3028_v26  ;;  %v3142_v32 = vsub.f32 %v15_v15, %v3103_v18  ;;  %v3153_v36 = vand.u32 4294901760, %v3119_v24  ;;  %v3156_v37 = vsub.f32 %v14_v16, %v3122_v25  ;;  %v3159_v38 = vand.u32 4294901760, %v13_v30  ;;  %s3002_s30 = scalar_lea.vmem %s2277_s29, 128  ;;  %p3007_p1 = scmp.lt.s32.totalorder %s2277_s29, %s2277_s29 }
   0x9   :  { %585 = vperm.xlu1 %2993, %v3060_v0   ;;  %v148_v33 = vsub.f32 %v3106_v19, %v3126_v27  ;;  %v155_v34 = vsub.f32 %v3109_v20, %v3129_v28  ;;  %2520 = vmatprep.subr.mxu0 %v3026_v10  ;;  %v162_v35 = vsub.f32 %v3112_v21, %v3132_v29  ;;  %v3029_v39 = vmov 5   ;;  %p3003_p0 = scmp.ne.s32.totalorder %s2277_s29, %s3002_s30  ;;  %p3008_p2 = scmp.lt.s32.totalorder %s3002_s30, %s3002_s30 }
   0xa   :  { %2521 = vmatpush3.msra.mxu0 %v3090_v13  ;;  %v3030_v42 = vmov 4   ;;  %v169_v43 = vsub.f32 %v3115_v22, %v3139_v31  ;;  %v3170_v44 = vand.u32 4294901760, %v3142_v32  ;;  %v3173_v45 = vsub.f32 %v13_v30, %v3159_v38 }
   0xb   :  { %v3161_v40 = vand.u32 4294901760, %v148_v33  ;;  %v3163_v41 = vand.u32 4294901760, %v155_v34  ;;  %2522 = vmatprep.subr.mxu0 %v3026_v10  ;;  %v3178_v46 = vand.u32 4294901760, %v162_v35  ;;  %v176_v47 = vsub.f32 %v3119_v24, %v3153_v36  ;;  %p3009_p3 = por %p3008_p2, %p3007_p1 }
   0xc   :  { %2995 = vset.pattern.permute.xlu0 %v3029_v39  ;;  %v3183_v48 = vand.u32 4294901760, %v3156_v37  ;;  %2523 = vmatpush3.msra.mxu0 %v3092_v14  ;;  %vm3031_vm0 = vmmov 0   ;;  %v3032_v49 = vmov 8   ;;  %v3190_v50 = vand.u32 4294901760, %v169_v43 }
   0xd   :  { %2994 = vset.pattern.permute.xlu1 %v3030_v42  ;;  %594 = vperm.xlu0 %2995, %v3066_v4   ;;  %v183_v51 = vsub.f32 %v3142_v32, %v3170_v44  ;;  %v3195_v52 = vand.u32 4294901760, %v3173_v45  ;;  %v3033_v53 = vmov 6   ;;  %v3200_v54 = vand.u32 4294901760, %v176_v47  ;;  %p3010_p4 = pnand %p3009_p3, %p3003_p0 }
   0xe   :  { %589 = vperm.xlu1 %2994, %v3076_v7   ;;  %2536 = vmatpush3.msra.mxu1 %v3161_v40  ;;  %v190_v55 = vsub.f32 %v3156_v37, %v3183_v48  ;;  %v3034_v58 = vmov 7   ;;  %v3035_v61 = vmov 9   ;;  %v3036_v62 = vmov 11  }
   0xf   :  { %2537 = vmatprep.subr.mxu1 %v3026_v10  ;;  %2551 = vmatprep.mubr.msk.f32.mxu1 %vm3031_vm0, %v3026_v10  ;;  %v3207_v56 = vand.u32 4294901760, %v183_v51  ;;  %v197_v57 = vsub.f32 %v3173_v45, %v3195_v52  ;;  %v3037_v63 = vmov 10   ;;  %vm41_vm5 = vcmask 523264  }
  0x10   :  { %2538 = vmatpush3.msra.mxu1 %v3163_v41  ;;  %2524 = vmatprep.subr.mxu0 %v3026_v10  ;;  %v3215_v59 = vand.u32 4294901760, %v190_v55 }
  0x11   :  { %2998 = vset.pattern.permute.xlu0 %v3032_v49  ;;  %2539 = vmatprep.subr.mxu1 %v3026_v10  ;;  %v3220_v60 = vand.u32 4294901760, %v197_v57 }
  0x12   :  { %2996 = vset.pattern.permute.xlu1 %v3033_v53  ;;  %1156 = vperm.xlu0 %2998, %v3066_v4  }
  0x13   :  { %1147 = vperm.xlu1 %2996, %v3060_v0   ;;  %2540 = vmatpush3.msra.mxu1 %v3178_v46 }
  0x14   :  { %2541 = vmatprep.subr.mxu1 %v3026_v10  ;;  %2525 = vmatpush3.msra.mxu0 %v3101_v17 }
  0x15   :  { %2542 = vmatpush3.msra.mxu1 %v3190_v50  ;;  %2526 = vmatprep.subr.mxu0 %v3026_v10 }
  0x16   :  { %2543 = vmatprep.subr.mxu1 %v3026_v10  ;;  %2527 = vmatpush3.msra.mxu0 %v3103_v18 }
  0x17   :  { %2997 = vset.pattern.permute.xlu1 %v3034_v58  ;;  %2544 = vmatpush3.msra.mxu1 %v3200_v54 }
  0x18   :  { %1151 = vperm.xlu1 %2997, %v3076_v7   ;;  %2545 = vmatprep.subr.mxu1 %v3026_v10 }
  0x19   :  { %2546 = vmatpush3.msra.mxu1 %v3207_v56  ;;  %2528 = vmatprep.subr.mxu0 %v3026_v10 }
  0x1a   :  { %2547 = vmatprep.subr.mxu1 %v3026_v10  ;;  %2529 = vmatpush3.msra.mxu0 %v3122_v25 }
  0x1b   :  { %2548 = vmatpush3.msra.mxu1 %v3215_v59  ;;  %2530 = vmatprep.subr.mxu0 %v3026_v10 }
  0x1c   :  { %2549 = vmatprep.subr.mxu1 %v3026_v10  ;;  %2999 = vset.pattern.permute.xlu1 %v3035_v61 }
  0x1d   :  { %2550 = vmatpush3.msra.mxu1 %v3220_v60  ;;  %1709 = vperm.xlu1 %2999, %v3060_v0   ;;  %v21_v0 = vlaneseq }
  0x1e   :  { %2573 = vmatprep.subr.mxu1 %v3026_v10  ;;  %2531 = vmatpush3.msra.mxu0 %v3159_v38 }
  0x1f   :  { %2532 = vmatprep.mubr.msk.f32.mxu0 %vm3031_vm0, %v3026_v10  ;;  %2554 = vmatprep.subr.mxu0 %v3026_v10  ;;  %v3238_v2 = vand.u32 127, %v21_v0 }
  0x20   :  { %3001 = vset.pattern.permute.xlu0 %v3036_v62 }
  0x21   :  { %3000 = vset.pattern.permute.xlu1 %v3037_v63  ;;  %1718 = vperm.xlu0 %3001, %v3066_v4  }
  0x22   :  { %1713 = vperm.xlu1 %3000, %v3076_v7  }
  0x7d   :  { %v25_v1 = vpop.permute.xlu0 %24 }
  0x7e   :  { %vm26_vm2 = vcmp.eq.s32.totalorder %v3238_v2, %v25_v1 }
  0x7f   :  { %v36_v3 = vpop.permute.xlu1 %35 }
  0x80   :  { %vm37_vm1 = vcmp.eq.s32.totalorder %v3238_v2, %v36_v3 }
  0x83   :  { %v30_v5 = vpop.permute.xlu0 %29 }
  0x84   :  { %vm31_vm3 = vcmp.eq.s32.totalorder %v3238_v2, %v30_v5  ;;  %v586_v16 = vpop.permute.xlu1 %585 }
  0x85   :  { %vm32_vm4 = vmor %vm26_vm2, %vm31_vm3  ;;  %vm587_vm7 = vcmp.eq.s32.totalorder %v3238_v2, %v586_v16 }
  0x86   :  { %vm38_vm6 = vmor %vm32_vm4, %vm37_vm1 }
  0x87   :  { %v3244_v6 = vsel %vm38_vm6, 1.0, %v3026_v10 }
  0x88   :  { %v43_v4 = vsel %vm41_vm5, %v3244_v6, 0  ;;  %2552 = vmatmul.mubr.msk.f32.vlgmr.msra.gmra.mxu1 %vm41_vm5, %v3244_v6  ;;  %v595_v26 = vpop.permute.xlu0 %594 }
  0x89   :  { %v119_v7 = vsub.f32 %v43_v4, %v43_v4  ;;  %2574 = vmatpush3.msra.mxu1 %v3086_v11  ;;  %2589 = vmatprep.mubr.msk.f32.mxu1 %vm3031_vm0, %v3026_v10  ;;  %v590_v23 = vpop.permute.xlu1 %589  ;;  %vm596_vm10 = vcmp.eq.s32.totalorder %v3238_v2, %v595_v26 }
  0x8a   :  { %2575 = vmatprep.subr.mxu1 %v3026_v10  ;;  %vm591_vm8 = vcmp.eq.s32.totalorder %v3238_v2, %v590_v23 }
  0x8b   :  { %2576 = vmatpush3.msra.mxu1 %v3088_v12  ;;  %v120_v8 = vand.u32 4294901760, %v119_v7  ;;  %vm592_vm9 = vmor %vm587_vm7, %vm591_vm8  ;;  %vm1706_vm8 = vcmask 785920  }
  0x8c   :  { %2577 = vmatprep.subr.mxu1 %v3026_v10  ;;  %vm597_vm11 = vmor %vm592_vm9, %vm596_vm10  ;;  %vm2268_vm9 = vcmask 1048320  }
  0x8d   :  { %2578 = vmatpush3.msra.mxu1 %v3090_v13  ;;  %v121_v9 = vsub.f32 %v119_v7, %v120_v8  ;;  %v3330_v30 = vsel %vm597_vm11, 1.0, %v3026_v10  ;;  %v1157_v49 = vpop.permute.xlu0 %1156 }
  0x8e   :  { %2579 = vmatprep.subr.mxu1 %v3026_v10  ;;  %v601_v33 = vsel %vm41_vm5, %v3330_v30, 0  ;;  %v1148_v43 = vpop.permute.xlu1 %1147  ;;  %vm1158_vm15 = vcmp.eq.s32.totalorder %v3238_v2, %v1157_v49 }
  0x8f   :  { %2580 = vmatpush3.msra.mxu1 %v3092_v14  ;;  %v122_v15 = vand.u32 4294901760, %v121_v9  ;;  %v3348_v34 = vsub.f32 %v601_v33, %v601_v33  ;;  %vm1149_vm12 = vcmp.eq.s32.totalorder %v3238_v2, %v1148_v43 }
  0x90   :  { %2581 = vmatprep.subr.mxu1 %v3026_v10 }
  0x91   :  { %2582 = vmatpush3.msra.mxu1 %v3101_v17  ;;  %2533 = vmatmul.mubr.f32.vlgmr.msra.gmra.mxu0 %v122_v15  ;;  %v678_v35 = vand.u32 4294901760, %v3348_v34 }
  0x92   :  { %2555 = vmatpush3.msra.mxu0 %v3106_v19  ;;  %2583 = vmatprep.subr.mxu1 %v3026_v10 }
  0x93   :  { %2556 = vmatprep.subr.mxu0 %v3026_v10  ;;  %2584 = vmatpush3.msra.mxu1 %v3103_v18  ;;  %v679_v39 = vsub.f32 %v3348_v34, %v678_v35  ;;  %v1152_v47 = vpop.permute.xlu1 %1151 }
  0x94   :  { %2557 = vmatpush3.msra.mxu0 %v3109_v20  ;;  %2585 = vmatprep.subr.mxu1 %v3026_v10  ;;  %vm1153_vm13 = vcmp.eq.s32.totalorder %v3238_v2, %v1152_v47 }
  0x95   :  { %2558 = vmatprep.subr.mxu0 %v3026_v10  ;;  %2586 = vmatpush3.msra.mxu1 %v3122_v25  ;;  %v680_v42 = vand.u32 4294901760, %v679_v39  ;;  %vm1154_vm14 = vmor %vm1149_vm12, %vm1153_vm13 }
  0x96   :  { %2559 = vmatpush3.msra.mxu0 %v3112_v21  ;;  %2587 = vmatprep.subr.mxu1 %v3026_v10  ;;  %vm1159_vm1 = vmor %vm1154_vm14, %vm1158_vm15 }
  0x97   :  { %2560 = vmatprep.subr.mxu0 %v3026_v10  ;;  %2588 = vmatpush3.msra.mxu1 %v3159_v38  ;;  %v3457_v51 = vsel %vm1159_vm1, 1.0, %v3026_v10 }
  0x98   :  { %2561 = vmatpush3.msra.mxu0 %v3115_v22  ;;  %2590 = vmatmul.mubr.f32.vlgmr.msra.gmra.mxu1 %v120_v8  ;;  %v1163_v53 = vsel %vm41_vm5, %v3457_v51, 0  ;;  %v1710_v62 = vpop.permute.xlu1 %1709 }
  0x99   :  { %2611 = vmatprep.subr.mxu1 %v3026_v10  ;;  %2562 = vmatprep.subr.mxu0 %v3026_v10  ;;  %v3475_v55 = vsub.f32 %v1163_v53, %v1163_v53  ;;  %vm1711_vm2 = vcmp.eq.s32.totalorder %v3238_v2, %v1710_v62 }
  0x9a   :  { %2612 = vmatpush3.msra.mxu1 %v3086_v11  ;;  %2563 = vmatpush3.msra.mxu0 %v3119_v24 }
  0x9b   :  { %2613 = vmatprep.subr.mxu1 %v3026_v10  ;;  %2564 = vmatprep.subr.mxu0 %v3026_v10  ;;  %v1240_v57 = vand.u32 4294901760, %v3475_v55 }
  0x9c   :  { %2614 = vmatpush3.msra.mxu1 %v3088_v12  ;;  %2565 = vmatpush3.msra.mxu0 %v3142_v32  ;;  %v1719_v0 = vpop.permute.xlu0 %1718 }
  0x9d   :  { %2615 = vmatprep.subr.mxu1 %v3026_v10  ;;  %2566 = vmatprep.subr.mxu0 %v3026_v10  ;;  %v1241_v58 = vsub.f32 %v3475_v55, %v1240_v57  ;;  %v1714_v63 = vpop.permute.xlu1 %1713  ;;  %vm1720_vm6 = vcmp.eq.s32.totalorder %v3238_v2, %v1719_v0 }
  0x9e   :  { %2616 = vmatpush3.msra.mxu1 %v3090_v13  ;;  %2567 = vmatpush3.msra.mxu0 %v3156_v37  ;;  %vm1715_vm3 = vcmp.eq.s32.totalorder %v3238_v2, %v1714_v63 }
  0x9f   :  { %2617 = vmatprep.subr.mxu1 %v3026_v10  ;;  %2568 = vmatprep.subr.mxu0 %v3026_v10  ;;  %v1242_v61 = vand.u32 4294901760, %v1241_v58  ;;  %vm1716_vm4 = vmor %vm1711_vm2, %vm1715_vm3 }
  0xa0   :  { %2618 = vmatpush3.msra.mxu1 %v3092_v14  ;;  %2569 = vmatpush3.msra.mxu0 %v3173_v45  ;;  %vm1721_vm7 = vmor %vm1716_vm4, %vm1720_vm6 }
  0xa1   :  { %2570 = vmatprep.mubr.msk.f32.mxu0 %vm3031_vm0, %v3026_v10  ;;  %2619 = vmatprep.subr.mxu1 %v3026_v10 }
  0xa2   :  { %2571 = vmatmul.mubr.f32.vlgmr.msra.gmra.mxu0 %v119_v7  ;;  %2592 = vmatprep.subr.mxu0 %v3026_v10 }
  0xa3   :  { %2620 = vmatpush3.msra.mxu1 %v3101_v17  ;;  %2593 = vmatpush3.msra.mxu0 %v3126_v27 }
  0xa4   :  { %2621 = vmatprep.subr.mxu1 %v3026_v10  ;;  %2594 = vmatprep.subr.mxu0 %v3026_v10 }
  0xa5   :  { %2622 = vmatpush3.msra.mxu1 %v3103_v18  ;;  %2595 = vmatpush3.msra.mxu0 %v3129_v28 }
  0xa6   :  { %2623 = vmatprep.subr.mxu1 %v3026_v10  ;;  %2596 = vmatprep.subr.mxu0 %v3026_v10 }
  0xa7   :  { %2624 = vmatpush3.msra.mxu1 %v3122_v25  ;;  %2597 = vmatpush3.msra.mxu0 %v3132_v29 }
  0xa8   :  { %2625 = vmatprep.subr.mxu1 %v3026_v10  ;;  %2598 = vmatprep.subr.mxu0 %v3026_v10 }
  0xa9   :  { %2626 = vmatpush3.msra.mxu1 %v3159_v38  ;;  %2627 = vmatprep.mubr.msk.f32.mxu1 %vm3031_vm0, %v3026_v10 }
  0xaa   :  { %2599 = vmatpush3.msra.mxu0 %v3139_v31  ;;  %2628 = vmatmul.mubr.msk.f32.vlgmr.msra.gmra.mxu1 %vm41_vm5, %v3244_v6 }
  0xab   :  { %2649 = vmatprep.subr.mxu1 %v3026_v10  ;;  %2600 = vmatprep.subr.mxu0 %v3026_v10 }
  0xac   :  { %2650 = vmatpush3.msra.mxu1 %v3161_v40  ;;  %2601 = vmatpush3.msra.mxu0 %v3153_v36 }
  0xad   :  { %2651 = vmatprep.subr.mxu1 %v3026_v10  ;;  %2602 = vmatprep.subr.mxu0 %v3026_v10 }
  0xae   :  { %2652 = vmatpush3.msra.mxu1 %v3163_v41  ;;  %2603 = vmatpush3.msra.mxu0 %v3170_v44 }
  0xaf   :  { %2653 = vmatprep.subr.mxu1 %v3026_v10  ;;  %2604 = vmatprep.subr.mxu0 %v3026_v10 }
  0xb0   :  { %2654 = vmatpush3.msra.mxu1 %v3178_v46  ;;  %2605 = vmatpush3.msra.mxu0 %v3183_v48 }
  0xb1   :  { %2655 = vmatprep.subr.mxu1 %v3026_v10  ;;  %2606 = vmatprep.subr.mxu0 %v3026_v10 }
  0xb2   :  { %2656 = vmatpush3.msra.mxu1 %v3190_v50  ;;  %2607 = vmatpush3.msra.mxu0 %v3195_v52 }
  0xb3   :  { %2608 = vmatprep.mubr.msk.f32.mxu0 %vm3031_vm0, %v3026_v10  ;;  %2657 = vmatprep.subr.mxu1 %v3026_v10 }
  0xb4   :  { %2609 = vmatmul.mubr.msk.f32.vlgmr.msra.gmra.mxu0 %vm41_vm5, %v3244_v6  ;;  %2630 = vmatprep.subr.mxu0 %v3026_v10 }
  0xb5   :  { %2658 = vmatpush3.msra.mxu1 %v3200_v54  ;;  %2631 = vmatpush3.msra.mxu0 %v3086_v11 }
  0xb6   :  { %2659 = vmatprep.subr.mxu1 %v3026_v10  ;;  %2632 = vmatprep.subr.mxu0 %v3026_v10 }
  0xb7   :  { %2660 = vmatpush3.msra.mxu1 %v3207_v56  ;;  %2633 = vmatpush3.msra.mxu0 %v3088_v12 }
  0xb8   :  { %2661 = vmatprep.subr.mxu1 %v3026_v10  ;;  %2634 = vmatprep.subr.mxu0 %v3026_v10 }
  0xb9   :  { %2662 = vmatpush3.msra.mxu1 %v3215_v59  ;;  %2635 = vmatpush3.msra.mxu0 %v3090_v13 }
  0xba   :  { %2663 = vmatprep.subr.mxu1 %v3026_v10  ;;  %2636 = vmatprep.subr.mxu0 %v3026_v10 }
  0xbb   :  { %2664 = vmatpush3.msra.mxu1 %v3220_v60  ;;  %2665 = vmatprep.mubr.msk.f32.mxu1 %vm3031_vm0, %v3026_v10 }
  0xbc   :  { %2637 = vmatpush3.msra.mxu0 %v3092_v14  ;;  %2666 = vmatmul.mubr.msk.f32.vlgmr.msra.gmra.mxu1 %vm41_vm5, %v3330_v30 }
  0xbd   :  { %2687 = vmatprep.subr.mxu1 %v3026_v10  ;;  %2638 = vmatprep.subr.mxu0 %v3026_v10 }
  0xbe   :  { %2688 = vmatpush3.msra.mxu1 %v3086_v11  ;;  %2639 = vmatpush3.msra.mxu0 %v3101_v17 }
  0xbf   :  { %2689 = vmatprep.subr.mxu1 %v3026_v10  ;;  %2640 = vmatprep.subr.mxu0 %v3026_v10 }
  0xc0   :  { %2690 = vmatpush3.msra.mxu1 %v3088_v12  ;;  %2641 = vmatpush3.msra.mxu0 %v3103_v18 }
  0xc1   :  { %2691 = vmatprep.subr.mxu1 %v3026_v10  ;;  %2642 = vmatprep.subr.mxu0 %v3026_v10 }
  0xc2   :  { %2692 = vmatpush3.msra.mxu1 %v3090_v13  ;;  %2643 = vmatpush3.msra.mxu0 %v3122_v25 }
  0xc3   :  { %2693 = vmatprep.subr.mxu1 %v3026_v10  ;;  %2644 = vmatprep.subr.mxu0 %v3026_v10 }
  0xc4   :  { %2694 = vmatpush3.msra.mxu1 %v3092_v14  ;;  %2645 = vmatpush3.msra.mxu0 %v3159_v38 }
  0xc5   :  { %2646 = vmatprep.mubr.msk.f32.mxu0 %vm3031_vm0, %v3026_v10  ;;  %2695 = vmatprep.subr.mxu1 %v3026_v10 }
  0xc6   :  { %2647 = vmatmul.mubr.f32.vlgmr.msra.gmra.mxu0 %v680_v42  ;;  %2668 = vmatprep.subr.mxu0 %v3026_v10 }
  0xc7   :  { %2696 = vmatpush3.msra.mxu1 %v3101_v17  ;;  %2669 = vmatpush3.msra.mxu0 %v3106_v19 }
  0xc8   :  { %2697 = vmatprep.subr.mxu1 %v3026_v10  ;;  %2670 = vmatprep.subr.mxu0 %v3026_v10 }
  0xc9   :  { %2698 = vmatpush3.msra.mxu1 %v3103_v18  ;;  %2671 = vmatpush3.msra.mxu0 %v3109_v20 }
  0xca   :  { %2699 = vmatprep.subr.mxu1 %v3026_v10  ;;  %2672 = vmatprep.subr.mxu0 %v3026_v10 }
  0xcb   :  { %2700 = vmatpush3.msra.mxu1 %v3122_v25  ;;  %2673 = vmatpush3.msra.mxu0 %v3112_v21 }
  0xcc   :  { %2701 = vmatprep.subr.mxu1 %v3026_v10  ;;  %2674 = vmatprep.subr.mxu0 %v3026_v10 }
  0xcd   :  { %2702 = vmatpush3.msra.mxu1 %v3159_v38  ;;  %2703 = vmatprep.mubr.msk.f32.mxu1 %vm3031_vm0, %v3026_v10 }
  0xce   :  { %2675 = vmatpush3.msra.mxu0 %v3115_v22  ;;  %2704 = vmatmul.mubr.f32.vlgmr.msra.gmra.mxu1 %v678_v35 }
  0xcf   :  { %2725 = vmatprep.subr.mxu1 %v3026_v10  ;;  %2676 = vmatprep.subr.mxu0 %v3026_v10 }
  0xd0   :  { %2726 = vmatpush3.msra.mxu1 %v3086_v11  ;;  %2677 = vmatpush3.msra.mxu0 %v3119_v24 }
  0xd1   :  { %2727 = vmatprep.subr.mxu1 %v3026_v10  ;;  %2678 = vmatprep.subr.mxu0 %v3026_v10 }
  0xd2   :  { %2728 = vmatpush3.msra.mxu1 %v3088_v12  ;;  %2679 = vmatpush3.msra.mxu0 %v3142_v32 }
  0xd3   :  { %2729 = vmatprep.subr.mxu1 %v3026_v10  ;;  %2680 = vmatprep.subr.mxu0 %v3026_v10 }
  0xd4   :  { %2730 = vmatpush3.msra.mxu1 %v3090_v13  ;;  %2681 = vmatpush3.msra.mxu0 %v3156_v37 }
  0xd5   :  { %2731 = vmatprep.subr.mxu1 %v3026_v10  ;;  %2682 = vmatprep.subr.mxu0 %v3026_v10 }
  0xd6   :  { %2732 = vmatpush3.msra.mxu1 %v3092_v14  ;;  %2683 = vmatpush3.msra.mxu0 %v3173_v45 }
  0xd7   :  { %2684 = vmatprep.mubr.msk.f32.mxu0 %vm3031_vm0, %v3026_v10  ;;  %2733 = vmatprep.subr.mxu1 %v3026_v10 }
  0xd8   :  { %2685 = vmatmul.mubr.f32.vlgmr.msra.gmra.mxu0 %v3348_v34  ;;  %2706 = vmatprep.subr.mxu0 %v3026_v10 }
  0xd9   :  { %2734 = vmatpush3.msra.mxu1 %v3101_v17  ;;  %2707 = vmatpush3.msra.mxu0 %v3126_v27 }
  0xda   :  { %2735 = vmatprep.subr.mxu1 %v3026_v10  ;;  %2708 = vmatprep.subr.mxu0 %v3026_v10 }
  0xdb   :  { %2736 = vmatpush3.msra.mxu1 %v3103_v18  ;;  %2709 = vmatpush3.msra.mxu0 %v3129_v28 }
  0xdc   :  { %2737 = vmatprep.subr.mxu1 %v3026_v10  ;;  %2710 = vmatprep.subr.mxu0 %v3026_v10 }
  0xdd   :  { %2738 = vmatpush3.msra.mxu1 %v3122_v25  ;;  %2711 = vmatpush3.msra.mxu0 %v3132_v29 }
  0xde   :  { %2739 = vmatprep.subr.mxu1 %v3026_v10  ;;  %2712 = vmatprep.subr.mxu0 %v3026_v10 }
  0xdf   :  { %2740 = vmatpush3.msra.mxu1 %v3159_v38  ;;  %2741 = vmatprep.mubr.msk.f32.mxu1 %vm3031_vm0, %v3026_v10 }
  0xe0   :  { %2713 = vmatpush3.msra.mxu0 %v3139_v31  ;;  %2742 = vmatmul.mubr.msk.f32.vlgmr.msra.gmra.mxu1 %vm41_vm5, %v3330_v30 }
  0xe1   :  { %2763 = vmatprep.subr.mxu1 %v3026_v10  ;;  %2714 = vmatprep.subr.mxu0 %v3026_v10 }
  0xe2   :  { %2764 = vmatpush3.msra.mxu1 %v3161_v40  ;;  %2715 = vmatpush3.msra.mxu0 %v3153_v36 }
  0xe3   :  { %2765 = vmatprep.subr.mxu1 %v3026_v10  ;;  %2716 = vmatprep.subr.mxu0 %v3026_v10 }
  0xe4   :  { %2766 = vmatpush3.msra.mxu1 %v3163_v41  ;;  %2717 = vmatpush3.msra.mxu0 %v3170_v44 }
  0xe5   :  { %2767 = vmatprep.subr.mxu1 %v3026_v10  ;;  %2718 = vmatprep.subr.mxu0 %v3026_v10 }
  0xe6   :  { %2768 = vmatpush3.msra.mxu1 %v3178_v46  ;;  %2719 = vmatpush3.msra.mxu0 %v3183_v48 }
  0xe7   :  { %2769 = vmatprep.subr.mxu1 %v3026_v10  ;;  %2720 = vmatprep.subr.mxu0 %v3026_v10 }
  0xe8   :  { %2770 = vmatpush3.msra.mxu1 %v3190_v50  ;;  %2721 = vmatpush3.msra.mxu0 %v3195_v52 }
  0xe9   :  { %2722 = vmatprep.mubr.msk.f32.mxu0 %vm3031_vm0, %v3026_v10  ;;  %2771 = vmatprep.subr.mxu1 %v3026_v10 }
  0xea   :  { %2723 = vmatmul.mubr.msk.f32.vlgmr.msra.gmra.mxu0 %vm41_vm5, %v3330_v30  ;;  %2744 = vmatprep.subr.mxu0 %v3026_v10 }
  0xeb   :  { %2772 = vmatpush3.msra.mxu1 %v3200_v54  ;;  %2745 = vmatpush3.msra.mxu0 %v3086_v11 }
  0xec   :  { %2773 = vmatprep.subr.mxu1 %v3026_v10  ;;  %2746 = vmatprep.subr.mxu0 %v3026_v10 }
  0xed   :  { %2774 = vmatpush3.msra.mxu1 %v3207_v56  ;;  %2747 = vmatpush3.msra.mxu0 %v3088_v12 }
  0xee   :  { %2775 = vmatprep.subr.mxu1 %v3026_v10  ;;  %2748 = vmatprep.subr.mxu0 %v3026_v10 }
  0xef   :  { %2776 = vmatpush3.msra.mxu1 %v3215_v59  ;;  %2749 = vmatpush3.msra.mxu0 %v3090_v13 }
  0xf0   :  { %2777 = vmatprep.subr.mxu1 %v3026_v10  ;;  %2750 = vmatprep.subr.mxu0 %v3026_v10 }
  0xf1   :  { %2778 = vmatpush3.msra.mxu1 %v3220_v60  ;;  %2779 = vmatprep.mubr.msk.f32.mxu1 %vm3031_vm0, %v3026_v10 }
  0xf2   :  { %2751 = vmatpush3.msra.mxu0 %v3092_v14  ;;  %2780 = vmatmul.mubr.msk.f32.vlgmr.msra.gmra.mxu1 %vm41_vm5, %v3457_v51 }
  0xf3   :  { %2801 = vmatprep.subr.mxu1 %v3026_v10  ;;  %2752 = vmatprep.subr.mxu0 %v3026_v10 }
  0xf4   :  { %2802 = vmatpush3.msra.mxu1 %v3086_v11  ;;  %2753 = vmatpush3.msra.mxu0 %v3101_v17 }
  0xf5   :  { %2803 = vmatprep.subr.mxu1 %v3026_v10  ;;  %2754 = vmatprep.subr.mxu0 %v3026_v10 }
  0xf6   :  { %2804 = vmatpush3.msra.mxu1 %v3088_v12  ;;  %2755 = vmatpush3.msra.mxu0 %v3103_v18 }
  0xf7   :  { %2805 = vmatprep.subr.mxu1 %v3026_v10  ;;  %2756 = vmatprep.subr.mxu0 %v3026_v10 }
  0xf8   :  { %2806 = vmatpush3.msra.mxu1 %v3090_v13  ;;  %2757 = vmatpush3.msra.mxu0 %v3122_v25 }
  0xf9   :  { %2807 = vmatprep.subr.mxu1 %v3026_v10  ;;  %2758 = vmatprep.subr.mxu0 %v3026_v10 }
  0xfa   :  { %2808 = vmatpush3.msra.mxu1 %v3092_v14  ;;  %2759 = vmatpush3.msra.mxu0 %v3159_v38 }
  0xfb   :  { %2760 = vmatprep.mubr.msk.f32.mxu0 %vm3031_vm0, %v3026_v10  ;;  %2809 = vmatprep.subr.mxu1 %v3026_v10 }
  0xfc   :  { %2761 = vmatmul.mubr.f32.vlgmr.msra.gmra.mxu0 %v1242_v61  ;;  %2782 = vmatprep.subr.mxu0 %v3026_v10 }
  0xfd   :  { %2810 = vmatpush3.msra.mxu1 %v3101_v17  ;;  %2783 = vmatpush3.msra.mxu0 %v3106_v19 }
  0xfe   :  { %2811 = vmatprep.subr.mxu1 %v3026_v10  ;;  %2784 = vmatprep.subr.mxu0 %v3026_v10 }
  0xff   :  { %2812 = vmatpush3.msra.mxu1 %v3103_v18  ;;  %2785 = vmatpush3.msra.mxu0 %v3109_v20 }
 0x100   :  { %2813 = vmatprep.subr.mxu1 %v3026_v10  ;;  %2786 = vmatprep.subr.mxu0 %v3026_v10 }
 0x101   :  { %2814 = vmatpush3.msra.mxu1 %v3122_v25  ;;  %2787 = vmatpush3.msra.mxu0 %v3112_v21 }
 0x102   :  { %2815 = vmatprep.subr.mxu1 %v3026_v10  ;;  %2788 = vmatprep.subr.mxu0 %v3026_v10 }
 0x103   :  { %2816 = vmatpush3.msra.mxu1 %v3159_v38  ;;  %2817 = vmatprep.mubr.msk.f32.mxu1 %vm3031_vm0, %v3026_v10 }
 0x104   :  { %2789 = vmatpush3.msra.mxu0 %v3115_v22  ;;  %2818 = vmatmul.mubr.f32.vlgmr.msra.gmra.mxu1 %v1240_v57 }
 0x105   :  { %2839 = vmatprep.subr.mxu1 %v3026_v10  ;;  %2790 = vmatprep.subr.mxu0 %v3026_v10 }
 0x106   :  { %2840 = vmatpush3.msra.mxu1 %v3086_v11  ;;  %2791 = vmatpush3.msra.mxu0 %v3119_v24 }
 0x107   :  { %2841 = vmatprep.subr.mxu1 %v3026_v10  ;;  %2792 = vmatprep.subr.mxu0 %v3026_v10 }
 0x108   :  { %2842 = vmatpush3.msra.mxu1 %v3088_v12  ;;  %2793 = vmatpush3.msra.mxu0 %v3142_v32 }
 0x109   :  { %2843 = vmatprep.subr.mxu1 %v3026_v10  ;;  %2794 = vmatprep.subr.mxu0 %v3026_v10 }
 0x10a   :  { %2844 = vmatpush3.msra.mxu1 %v3090_v13  ;;  %2795 = vmatpush3.msra.mxu0 %v3156_v37 }
 0x10b   :  { %2845 = vmatprep.subr.mxu1 %v3026_v10  ;;  %2796 = vmatprep.subr.mxu0 %v3026_v10 }
 0x10c   :  { %2846 = vmatpush3.msra.mxu1 %v3092_v14  ;;  %2797 = vmatpush3.msra.mxu0 %v3173_v45 }
 0x10d   :  { %2798 = vmatprep.mubr.msk.f32.mxu0 %vm3031_vm0, %v3026_v10  ;;  %2847 = vmatprep.subr.mxu1 %v3026_v10 }
 0x10e   :  { %2799 = vmatmul.mubr.f32.vlgmr.msra.gmra.mxu0 %v3475_v55  ;;  %2820 = vmatprep.subr.mxu0 %v3026_v10 }
 0x10f   :  { %2848 = vmatpush3.msra.mxu1 %v3101_v17  ;;  %2821 = vmatpush3.msra.mxu0 %v3126_v27 }
 0x110   :  { %2849 = vmatprep.subr.mxu1 %v3026_v10  ;;  %2822 = vmatprep.subr.mxu0 %v3026_v10 }
 0x111   :  { %2850 = vmatpush3.msra.mxu1 %v3103_v18  ;;  %2823 = vmatpush3.msra.mxu0 %v3129_v28 }
 0x112   :  { %2851 = vmatprep.subr.mxu1 %v3026_v10  ;;  %2824 = vmatprep.subr.mxu0 %v3026_v10 }
 0x113   :  { %2852 = vmatpush3.msra.mxu1 %v3122_v25  ;;  %2825 = vmatpush3.msra.mxu0 %v3132_v29 }
 0x114   :  { %2853 = vmatprep.subr.mxu1 %v3026_v10  ;;  %2826 = vmatprep.subr.mxu0 %v3026_v10 }
 0x115   :  { %2854 = vmatpush3.msra.mxu1 %v3159_v38  ;;  %2855 = vmatprep.mubr.msk.f32.mxu1 %vm3031_vm0, %v3026_v10 }
 0x116   :  { %2827 = vmatpush3.msra.mxu0 %v3139_v31  ;;  %2856 = vmatmul.mubr.msk.f32.vlgmr.msra.gmra.mxu1 %vm41_vm5, %v3457_v51 }
 0x117   :  { %2877 = vmatprep.subr.mxu1 %v3026_v10  ;;  %2828 = vmatprep.subr.mxu0 %v3026_v10 }
 0x118   :  { %2878 = vmatpush3.msra.mxu1 %v3161_v40  ;;  %2829 = vmatpush3.msra.mxu0 %v3153_v36  ;;  %v3584_v40 = vsel %vm1721_vm7, 1.0, %v3026_v10 }
 0x119   :  { %2879 = vmatprep.subr.mxu1 %v3026_v10  ;;  %2830 = vmatprep.subr.mxu0 %v3026_v10 }
 0x11a   :  { %2880 = vmatpush3.msra.mxu1 %v3163_v41  ;;  %2831 = vmatpush3.msra.mxu0 %v3170_v44  ;;  %v1725_v41 = vsel %vm41_vm5, %v3584_v40, 0 }
 0x11b   :  { %2881 = vmatprep.subr.mxu1 %v3026_v10  ;;  %2832 = vmatprep.subr.mxu0 %v3026_v10 }
 0x11c   :  { %2882 = vmatpush3.msra.mxu1 %v3178_v46  ;;  %2833 = vmatpush3.msra.mxu0 %v3183_v48  ;;  %v3602_v46 = vsub.f32 %v1725_v41, %v1725_v41 }
 0x11d   :  { %2883 = vmatprep.subr.mxu1 %v3026_v10  ;;  %2834 = vmatprep.subr.mxu0 %v3026_v10 }
 0x11e   :  { %2884 = vmatpush3.msra.mxu1 %v3190_v50  ;;  %2835 = vmatpush3.msra.mxu0 %v3195_v52  ;;  %v1802_v50 = vand.u32 4294901760, %v3602_v46 }
 0x11f   :  { %2836 = vmatprep.mubr.msk.f32.mxu0 %vm3031_vm0, %v3026_v10  ;;  %2885 = vmatprep.subr.mxu1 %v3026_v10 }
 0x120   :  { %2837 = vmatmul.mubr.msk.f32.vlgmr.msra.gmra.mxu0 %vm41_vm5, %v3457_v51  ;;  %2858 = vmatprep.subr.mxu0 %v3026_v10 }
 0x121   :  { %2886 = vmatpush3.msra.mxu1 %v3200_v54  ;;  %2859 = vmatpush3.msra.mxu0 %v3086_v11  ;;  %v1803_v54 = vsub.f32 %v3602_v46, %v1802_v50 }
 0x122   :  { %2887 = vmatprep.subr.mxu1 %v3026_v10  ;;  %2860 = vmatprep.subr.mxu0 %v3026_v10 }
 0x123   :  { %2888 = vmatpush3.msra.mxu1 %v3207_v56  ;;  %2861 = vmatpush3.msra.mxu0 %v3088_v12  ;;  %v1804_v56 = vand.u32 4294901760, %v1803_v54 }
 0x124   :  { %2889 = vmatprep.subr.mxu1 %v3026_v10  ;;  %2862 = vmatprep.subr.mxu0 %v3026_v10 }
 0x125   :  { %2890 = vmatpush3.msra.mxu1 %v3215_v59  ;;  %2863 = vmatpush3.msra.mxu0 %v3090_v13 }
 0x126   :  { %2891 = vmatprep.subr.mxu1 %v3026_v10  ;;  %2864 = vmatprep.subr.mxu0 %v3026_v10 }
 0x127   :  { %2892 = vmatpush3.msra.mxu1 %v3220_v60  ;;  %2893 = vmatprep.mubr.msk.f32.mxu1 %vm3031_vm0, %v3026_v10 }
 0x128   :  { %2865 = vmatpush3.msra.mxu0 %v3092_v14  ;;  %2894 = vmatmul.mubr.msk.f32.vlgmr.msra.gmra.mxu1 %vm41_vm5, %v3584_v40 }
 0x129   :  { %2915 = vmatprep.subr.mxu1 %v3026_v10  ;;  %2866 = vmatprep.subr.mxu0 %v3026_v10 }
 0x12a   :  { %2916 = vmatpush3.msra.mxu1 %v3086_v11  ;;  %2867 = vmatpush3.msra.mxu0 %v3101_v17 }
 0x12b   :  { %2917 = vmatprep.subr.mxu1 %v3026_v10  ;;  %2868 = vmatprep.subr.mxu0 %v3026_v10 }
 0x12c   :  { %2918 = vmatpush3.msra.mxu1 %v3088_v12  ;;  %2869 = vmatpush3.msra.mxu0 %v3103_v18 }
 0x12d   :  { %2919 = vmatprep.subr.mxu1 %v3026_v10  ;;  %2870 = vmatprep.subr.mxu0 %v3026_v10 }
 0x12e   :  { %2920 = vmatpush3.msra.mxu1 %v3090_v13  ;;  %2871 = vmatpush3.msra.mxu0 %v3122_v25 }
 0x12f   :  { %2921 = vmatprep.subr.mxu1 %v3026_v10  ;;  %2872 = vmatprep.subr.mxu0 %v3026_v10 }
 0x130   :  { %2922 = vmatpush3.msra.mxu1 %v3092_v14  ;;  %2873 = vmatpush3.msra.mxu0 %v3159_v38 }
 0x131   :  { %2874 = vmatprep.mubr.msk.f32.mxu0 %vm3031_vm0, %v3026_v10  ;;  %2923 = vmatprep.subr.mxu1 %v3026_v10 }
 0x132   :  { %2875 = vmatmul.mubr.f32.vlgmr.msra.gmra.mxu0 %v1804_v56  ;;  %2896 = vmatprep.subr.mxu0 %v3026_v10 }
 0x133   :  { %2924 = vmatpush3.msra.mxu1 %v3101_v17  ;;  %2897 = vmatpush3.msra.mxu0 %v3106_v19 }
 0x134   :  { %2925 = vmatprep.subr.mxu1 %v3026_v10  ;;  %2898 = vmatprep.subr.mxu0 %v3026_v10 }
 0x135   :  { %2926 = vmatpush3.msra.mxu1 %v3103_v18  ;;  %2899 = vmatpush3.msra.mxu0 %v3109_v20 }
 0x136   :  { %2927 = vmatprep.subr.mxu1 %v3026_v10  ;;  %2900 = vmatprep.subr.mxu0 %v3026_v10 }
 0x137   :  { %2928 = vmatpush3.msra.mxu1 %v3122_v25  ;;  %2901 = vmatpush3.msra.mxu0 %v3112_v21 }
 0x138   :  { %2929 = vmatprep.subr.mxu1 %v3026_v10  ;;  %2902 = vmatprep.subr.mxu0 %v3026_v10 }
 0x139   :  { %2930 = vmatpush3.msra.mxu1 %v3159_v38  ;;  %2931 = vmatprep.mubr.msk.f32.mxu1 %vm3031_vm0, %v3026_v10 }
 0x13a   :  { %2903 = vmatpush3.msra.mxu0 %v3115_v22  ;;  %2932 = vmatmul.mubr.f32.vlgmr.msra.gmra.mxu1 %v1802_v50 }
 0x13b   :  { %2953 = vmatprep.subr.mxu1 %v3026_v10  ;;  %2904 = vmatprep.subr.mxu0 %v3026_v10 }
 0x13c   :  { %2954 = vmatpush3.msra.mxu1 %v3086_v11  ;;  %2905 = vmatpush3.msra.mxu0 %v3119_v24 }
 0x13d   :  { %2955 = vmatprep.subr.mxu1 %v3026_v10  ;;  %2906 = vmatprep.subr.mxu0 %v3026_v10 }
 0x13e   :  { %2956 = vmatpush3.msra.mxu1 %v3088_v12  ;;  %2907 = vmatpush3.msra.mxu0 %v3142_v32 }
 0x13f   :  { %2957 = vmatprep.subr.mxu1 %v3026_v10  ;;  %2908 = vmatprep.subr.mxu0 %v3026_v10 }
 0x140   :  { %2958 = vmatpush3.msra.mxu1 %v3090_v13  ;;  %2909 = vmatpush3.msra.mxu0 %v3156_v37 }
 0x141   :  { %2959 = vmatprep.subr.mxu1 %v3026_v10  ;;  %2910 = vmatprep.subr.mxu0 %v3026_v10 }
 0x142   :  { %2960 = vmatpush3.msra.mxu1 %v3092_v14  ;;  %2911 = vmatpush3.msra.mxu0 %v3173_v45 }
 0x143   :  { %2912 = vmatprep.mubr.msk.f32.mxu0 %vm3031_vm0, %v3026_v10  ;;  %2961 = vmatprep.subr.mxu1 %v3026_v10 }
 0x144   :  { %2913 = vmatmul.mubr.f32.vlgmr.msra.gmra.mxu0 %v3602_v46  ;;  %2934 = vmatprep.subr.mxu0 %v3026_v10 }
 0x145   :  { %2962 = vmatpush3.msra.mxu1 %v3101_v17  ;;  %2935 = vmatpush3.msra.mxu0 %v3126_v27 }
 0x146   :  { %2963 = vmatprep.subr.mxu1 %v3026_v10  ;;  %2936 = vmatprep.subr.mxu0 %v3026_v10 }
 0x147   :  { %2964 = vmatpush3.msra.mxu1 %v3103_v18  ;;  %2937 = vmatpush3.msra.mxu0 %v3129_v28 }
 0x148   :  { %2965 = vmatprep.subr.mxu1 %v3026_v10  ;;  %2938 = vmatprep.subr.mxu0 %v3026_v10  ;;  %v235_v11 = vpop.f32.mrf.mxu1 }
 0x149   :  { %2966 = vmatpush3.msra.mxu1 %v3122_v25  ;;  %2939 = vmatpush3.msra.mxu0 %v3132_v29 }
 0x14a   :  { %2967 = vmatprep.subr.mxu1 %v3026_v10  ;;  %2940 = vmatprep.subr.mxu0 %v3026_v10  ;;  %v2553_v12 = vpop.f32.mrf.mxu1 }
 0x14b   :  { %2968 = vmatpush3.msra.mxu1 %v3159_v38  ;;  %2969 = vmatprep.mubr.msk.f32.mxu1 %vm3031_vm0, %v3026_v10 }
 0x14c   :  { %2941 = vmatpush3.msra.mxu0 %v3139_v31  ;;  %2970 = vmatmul.mubr.msk.f32.vlgmr.msra.gmra.mxu1 %vm41_vm5, %v3584_v40 }
 0x14d   :  { %2942 = vmatprep.subr.mxu0 %v3026_v10  ;;  %2950 = vmatprep.mubr.msk.f32.mxu0 %vm3031_vm0, %v3026_v10  ;;  %vm582_vm0 = vcmask 261120  }
 0x14e   :  { %2943 = vmatpush3.msra.mxu0 %v3153_v36 }
 0x14f   :  { %2944 = vmatprep.subr.mxu0 %v3026_v10 }
 0x150   :  { %2945 = vmatpush3.msra.mxu0 %v3170_v44 }
 0x151   :  { %2946 = vmatprep.subr.mxu0 %v3026_v10  ;;  %v124_v13 = vpop.f32.mrf.mxu0 }
 0x152   :  { %2947 = vmatpush3.msra.mxu0 %v3183_v48  ;;  %v236_v24 = vadd.f32 %v235_v11, %v124_v13 }
 0x153   :  { %2948 = vmatprep.subr.mxu0 %v3026_v10  ;;  %v2534_v14 = vpop.f32.mrf.mxu0 }
 0x154   :  { %2949 = vmatpush3.msra.mxu0 %v3195_v52 }
 0x155   :  { %2951 = vmatmul.mubr.msk.f32.vlgmr.msra.gmra.mxu0 %vm41_vm5, %v3584_v40  ;;  %vm1144_vm5 = vcmask 523520  }
 0x158   :  { %v404_v17 = vpop.f32.mrf.mxu1 }
 0x15a   :  { %v2591_v18 = vpop.f32.mrf.mxu1 }
 0x162   :  { %v323_v19 = vpop.f32.mrf.mxu0 }
 0x163   :  { %v324_v25 = vadd.f32 %v323_v19, %v236_v24 }
 0x164   :  { %v2572_v20 = vpop.f32.mrf.mxu0 }
 0x165   :  { %v405_v27 = vadd.f32 %v404_v17, %v324_v25 }
 0x16a   :  { %v578_v21 = vpop.f32.mrf.mxu1 }
 0x16c   :  { %v2629_v22 = vpop.f32.mrf.mxu1 }
 0x174   :  { %v499_v28 = vpop.f32.mrf.mxu0 }
 0x175   :  { %v500_v29 = vadd.f32 %v499_v28, %v405_v27 }
 0x176   :  { %v2610_v31 = vpop.f32.mrf.mxu0 }
 0x177   :  { %v579_v10 = vadd.f32 %v578_v21, %v500_v29 }
 0x179   :  { %583 = vst.msk [vmem:[#allocation2] sm:$0xff] %vm582_vm0, %v579_v10 }
 0x17c   :  { %v793_v32 = vpop.f32.mrf.mxu1 }
 0x17e   :  { %v2667_v36 = vpop.f32.mrf.mxu1 }
 0x186   :  { %v682_v37 = vpop.f32.mrf.mxu0 }
 0x187   :  { %v794_v1 = vadd.f32 %v793_v32, %v682_v37 }
 0x188   :  { %v2648_v38 = vpop.f32.mrf.mxu0 }
 0x18e   :  { %v962_v44 = vpop.f32.mrf.mxu1 }
 0x190   :  { %v2705_v45 = vpop.f32.mrf.mxu1 }
 0x198   :  { %v881_v48 = vpop.f32.mrf.mxu0 }
 0x199   :  { %v882_v2 = vadd.f32 %v881_v48, %v794_v1 }
 0x19a   :  { %v2686_v52 = vpop.f32.mrf.mxu0 }
 0x19b   :  { %v963_v3 = vadd.f32 %v962_v44, %v882_v2 }
 0x1a0   :  { %v1136_v59 = vpop.f32.mrf.mxu1 }
 0x1a2   :  { %v2743_v60 = vpop.f32.mrf.mxu1 }
 0x1aa   :  { %v1057_v5 = vpop.f32.mrf.mxu0 }
 0x1ab   :  { %v1058_v6 = vadd.f32 %v1057_v5, %v963_v3 }
 0x1ac   :  { %v2724_v4 = vpop.f32.mrf.mxu0 }
 0x1ad   :  { %v1137_v7 = vadd.f32 %v1136_v59, %v1058_v6 }
 0x1af   :  { %1141 = vrot.lane.b32.xlu1 %v1137_v7, %s3038_s1 }
 0x1b2   :  { %v1355_v8 = vpop.f32.mrf.mxu1 }
 0x1b4   :  { %v2781_v9 = vpop.f32.mrf.mxu1 }
 0x1bc   :  { %v1244_v15 = vpop.f32.mrf.mxu0 }
 0x1bd   :  { %v1356_v39 = vadd.f32 %v1355_v8, %v1244_v15 }
 0x1be   :  { %v2762_v16 = vpop.f32.mrf.mxu0 }
 0x1c4   :  { %v1524_v23 = vpop.f32.mrf.mxu1 }
 0x1c6   :  { %v2819_v26 = vpop.f32.mrf.mxu1 }
 0x1ce   :  { %v1443_v30 = vpop.f32.mrf.mxu0 }
 0x1cf   :  { %v1444_v42 = vadd.f32 %v1443_v30, %v1356_v39 }
 0x1d0   :  { %v2800_v33 = vpop.f32.mrf.mxu0 }
 0x1d1   :  { %v1525_v43 = vadd.f32 %v1524_v23, %v1444_v42 }
 0x1d6   :  { %v1698_v34 = vpop.f32.mrf.mxu1 }
 0x1d8   :  { %v2857_v35 = vpop.f32.mrf.mxu1 }
 0x1e0   :  { %v1619_v47 = vpop.f32.mrf.mxu0 }
 0x1e1   :  { %v1620_v49 = vadd.f32 %v1619_v47, %v1525_v43 }
 0x1e2   :  { %v2838_v51 = vpop.f32.mrf.mxu0 }
 0x1e3   :  { %v1699_v53 = vadd.f32 %v1698_v34, %v1620_v49 }
 0x1e5   :  { %1703 = vrot.lane.b32.xlu1 %v1699_v53, %s3039_s26 }
 0x1e8   :  { %v1917_v55 = vpop.f32.mrf.mxu1 }
 0x1ea   :  { %v2895_v57 = vpop.f32.mrf.mxu1 }
 0x1f2   :  { %v1806_v58 = vpop.f32.mrf.mxu0 }
 0x1f3   :  { %v1918_v46 = vadd.f32 %v1917_v55, %v1806_v58 }
 0x1f4   :  { %v2876_v61 = vpop.f32.mrf.mxu0 }
 0x1fa   :  { %v2086_v62 = vpop.f32.mrf.mxu1 }
 0x1fc   :  { %v2933_v63 = vpop.f32.mrf.mxu1 }
 0x204   :  { %v2005_v0 = vpop.f32.mrf.mxu0 }
 0x205   :  { %v2006_v54 = vadd.f32 %v2005_v0, %v1918_v46 }
 0x206   :  { %v2914_v40 = vpop.f32.mrf.mxu0 }
 0x207   :  { %v2087_v56 = vadd.f32 %v2086_v62, %v2006_v54 }
 0x20c   :  { %v2260_v41 = vpop.f32.mrf.mxu1 }
 0x20e   :  { %v2971_v50 = vpop.f32.mrf.mxu1 }
 0x215   :  { %v2181_v11 = vpop.f32.mrf.mxu0 }
 0x216   :  { %v2182_v12 = vadd.f32 %v2181_v11, %v2087_v56 }
 0x217   :  { %v2952_v13 = vpop.f32.mrf.mxu0 }
 0x218   :  { %v2261_v14 = vadd.f32 %v2260_v41, %v2182_v12 }
 0x21a   :  { %2265 = vrot.lane.b32.xlu0 %v2261_v14, %s3040_s27 }
 0x221   :  { %v1142_v17 = vpop.permute.xlu1 %1141 }
 0x222   :  { %1145 = vst.msk [vmem:[#allocation2] sm:$0xff] %vm1144_vm5, %v1142_v17 }
 0x257   :  { %v1704_v18 = vpop.permute.xlu1 %1703 }
 0x258   :  { %1707 = vst.msk [vmem:[#allocation2] sm:$0xff] %vm1706_vm8, %v1704_v18 }
 0x28c   :  { %v2266_v19 = vpop.permute.xlu0 %2265 }
 0x28d   :  { %2269 = vst.msk [vmem:[#allocation2] sm:$0xff] %vm2268_vm9, %v2266_v19 }
 0x28e   :  { %3013 = shalt.err (!%p3010_p4)
}
 0x28f   :  { %2279 = dma.vmem_to_hbm [thread:$0]  %s2277_s29, 128, %s3710_s2, [#allocation3]  }
 0x290   :  { %3022 = dma.done.wait [#allocation3], 128  }
 0x291   :  { %3023 = vsyncadd [#allocation3], 4294967168 }
 0x292   :  { %2283 = vsyncpa [#allocation3], 1 }

</bundles_post_ra>
